<compile_context>
chip_gen: v5e
topology: v5e:2x2
jax: 0.10.0
libtpu: 0.0.40
codegen_flags: <defaults>
</compile_context>

<pallas_src>
import jax
import jax.numpy as jnp
import numpy as np
from jax.experimental import pallas as pl
from jax.experimental.pallas import tpu as pltpu


# ----------------------------- chip-aware budgets -----------------------------

def _round_up(x, m):
    return ((x + m - 1) // m) * m


def _vmem_budgets():
    """(vmem_limit_bytes, conv1x1 block budget, conv3x3 block budget), chip-aware."""
    try:
        vmem = int(pltpu.get_tpu_info().vmem_capacity_bytes)
    except Exception:
        vmem = 64 * 1024 * 1024            # unknown -> assume the small (v7x) VMEM
    if vmem >= 100 * 1024 * 1024:          # v5e / v6e class (128 MiB VMEM)
        return 96 * 1024 * 1024, 12 * 1024 * 1024, 16 * 1024 * 1024
    return 48 * 1024 * 1024, 4 * 1024 * 1024, 8 * 1024 * 1024


def _pick_tm(m, cin, cout, budget_bytes):
    """Row tile for the (M,Cin)@(Cin,Cout) pointwise matmul: multiple of 256 (MXU
    pass size), sized to budget, and capped so there are >=2 blocks when M allows
    (keeps both v7x TensorCores busy)."""
    if m <= 256:
        return m
    per_row = 2 * 2 * (cin + 2 * cout)                 # bf16 in/res/out, double-buffered
    tm = max(256, (budget_bytes // max(per_row, 1)) // 256 * 256)
    tm = min(tm, _round_up(pl.cdiv(m, 2), 256))        # >= 2 grid steps
    return max(256, min(tm, _round_up(m, 256)))


def _pick_row_tile(h, w_pad, cin, cout, budget_bytes):
    """Row tile TH (multiple of 8; need NOT divide H - H is zero-padded instead)."""
    def vmem_est(th):
        window = (th + 2) * (w_pad + 2) * cin * 2      # DMA scratch (bf16, 1 buffer)
        planes = 3 * (th + 2) * w_pad * cin * 2        # hoisted width-shifted planes
        slabs_acc = th * w_pad * (cin * 2 + cout * 4)  # tap slab + f32 accumulator
        out_blk = 2 * th * w_pad * cout * 2            # double-buffered bf16 output
        return window + planes + slabs_acc + out_blk

    th = 8
    while th + 8 <= _round_up(h, 8) and vmem_est(th + 8) <= budget_bytes:
        th += 8
    if h > 8:                                          # >= 2 row blocks for megacore
        th = min(th, _round_up(pl.cdiv(h, 2), 8))
    return th


# ------------------------------- Pallas kernels -------------------------------

def _conv1x1_kernel(x_ref, w_ref, b_ref, o_ref):
    # x: (TM, Cin) bf16, w: (Cin, Cout) bf16, b: (1, Cout) f32 -> o: (TM, Cout) bf16
    o_ref[...] = (jnp.dot(x_ref[...], w_ref[...], preferred_element_type=jnp.float32)
                  + b_ref[...]).astype(o_ref.dtype)


def _conv1x1_add_kernel(x_ref, w_ref, b_ref, r_ref, o_ref):
    # Fused lateral 1x1 conv + bias + top-down residual add (f32 accumulation).
    o_ref[...] = (jnp.dot(x_ref[...], w_ref[...], preferred_element_type=jnp.float32)
                  + b_ref[...] + r_ref[...].astype(jnp.float32)).astype(o_ref.dtype)


def _conv3x3_kernel(x_hbm, w_ref, b_ref, o_ref, xbuf, sem):
    # x_hbm: full padded input (N, Hp+2, Wp+2, Cin) bf16 in HBM (memory_space=ANY)
    # w_ref: (9, Cin, Cout) bf16, b_ref: (1, Cout) f32
    # o_ref: (1, 1, TH*Wp, Cout) bf16 ; xbuf: VMEM (TH+2, Wp+2, Cin) bf16
    thp2, wp2, cin = xbuf.shape
    th, w_pad = thp2 - 2, wp2 - 2
    cout = o_ref.shape[-1]
    ni, ti = pl.program_id(0), pl.program_id(1)

    # Window DMA straight from HBM: removes the halo-duplicated stack HBM pass.
    cp = pltpu.make_async_copy(x_hbm.at[ni, pl.ds(ti * th, th + 2)], xbuf, sem.at[0])
    cp.start()
    cp.wait()

    xv = xbuf[...]                                                   # bf16
    # Hoist the width (kw) shift: 3 sublane-relayout slices instead of 9.
    planes = [xv[:, kw:kw + w_pad, :] for kw in range(3)]

    acc = jnp.zeros((th * w_pad, cout), jnp.float32)
    for kh in range(3):
        for kw in range(3):
            # Row slice is tile-granular (free); reshape is aligned (w_pad % 16 == 0).
            slab = planes[kw][kh:kh + th].reshape(th * w_pad, cin)
            acc = acc + jnp.dot(slab, w_ref[kh * 3 + kw],
                                preferred_element_type=jnp.float32)
    o_ref[0, 0] = (acc + b_ref[...]).astype(o_ref.dtype)


def _conv3x3_s2_kernel(ee_ref, eo_ref, oe_ref, oo_ref, w_ref, b_ref, o_ref):
    # Direct stride-2 3x3 conv on parity-split planes; each plane:
    # (1, Ho+1, Wop+1, Cin) bf16. o_ref: (1, Ho*Wop, Cout) bf16.
    hop1, wop1, cin = ee_ref.shape[1:]
    ho, wo_pad = hop1 - 1, wop1 - 1
    cout = o_ref.shape[-1]
    ee, eo, oe, oo = ee_ref[0], eo_ref[0], oe_ref[0], oo_ref[0]

    # Hoist the 6 distinct (plane, dw) width shifts (not 9).
    shifted = {
        ("ee", 0): ee[:, :wo_pad, :], ("ee", 1): ee[:, 1:1 + wo_pad, :],
        ("eo", 0): eo[:, :wo_pad, :],
        ("oe", 0): oe[:, :wo_pad, :], ("oe", 1): oe[:, 1:1 + wo_pad, :],
        ("oo", 0): oo[:, :wo_pad, :],
    }
    # out[h, w] = sum_{kh,kw} xpad[2h+kh, 2w+kw] @ W[kh, kw]; parity split turns the
    # stride-2 taps into unit shifts of the four parity planes.
    taps = (("ee", 0, 0, 0), ("eo", 0, 0, 1), ("ee", 0, 1, 2),
            ("oe", 0, 0, 3), ("oo", 0, 0, 4), ("oe", 0, 1, 5),
            ("ee", 1, 0, 6), ("eo", 1, 0, 7), ("ee", 1, 1, 8))

    acc = jnp.zeros((ho * wo_pad, cout), jnp.float32)
    for name, dh, dw, k in taps:
        slab = shifted[(name, dw)][dh:dh + ho].reshape(ho * wo_pad, cin)
        acc = acc + jnp.dot(slab, w_ref[k], preferred_element_type=jnp.float32)
    o_ref[0] = (acc + b_ref[...]).astype(o_ref.dtype)


# ------------------------------- Pallas wrappers -------------------------------

def conv1x1(x, w, b, residual=None):
    """1x1 conv (+ optional fused residual add). x: (N,H,W,Cin) -> (N,H,W,Cout) bf16."""
    n, h, wd, cin = x.shape
    cout = w.shape[-1]
    m = n * h * wd
    vmem_limit, tm_budget, _ = _vmem_budgets()
    tm = _pick_tm(m, cin, cout, tm_budget)

    xm = x.astype(jnp.bfloat16).reshape(m, cin)
    wq = w.astype(jnp.bfloat16)
    b2 = b.reshape(1, cout).astype(jnp.float32)

    in_specs = [pl.BlockSpec((tm, cin), lambda i: (i, 0)),
                pl.BlockSpec((cin, cout), lambda i: (0, 0)),
                pl.BlockSpec((1, cout), lambda i: (0, 0))]
    args = [xm, wq, b2]
    kernel = _conv1x1_kernel
    if residual is not None:
        in_specs.append(pl.BlockSpec((tm, cout), lambda i: (i, 0)))
        args.append(residual.astype(jnp.bfloat16).reshape(m, cout))
        kernel = _conv1x1_add_kernel

    y = pl.pallas_call(
        kernel,
        out_shape=jax.ShapeDtypeStruct((m, cout), jnp.bfloat16),
        grid=(pl.cdiv(m, tm),),
        in_specs=in_specs,
        out_specs=pl.BlockSpec((tm, cout), lambda i: (i, 0)),
        compiler_params=pltpu.CompilerParams(
            dimension_semantics=("parallel",),
            vmem_limit_bytes=vmem_limit),
    )(*args)
    return y.reshape(n, h, wd, cout)


def conv3x3_same(x, w, b):
    """3x3 conv, stride 1, pad 1. x: (N,H,W,Cin) -> (N,H,W,Cout) bf16."""
    n, h, wd, cin = x.shape
    cout = w.shape[-1]
    vmem_limit, _, row_budget = _vmem_budgets()
    w_pad = _round_up(wd, 16)                       # slab path always (M = TH*W_pad)
    th = _pick_row_tile(h, w_pad, cin, cout, row_budget)
    h_pad = _round_up(h, th)                        # TH need not divide H
    ht = h_pad // th

    x = x.astype(jnp.bfloat16)
    # Single combined pad pass: 1-px conv halo + H/W alignment padding (all zeros).
    xp = jnp.pad(x, ((0, 0), (1, 1 + (h_pad - h)), (1, 1 + (w_pad - wd)), (0, 0)))
    w9 = w.reshape(9, cin, cout).astype(jnp.bfloat16)
    b2 = b.reshape(1, cout).astype(jnp.float32)

    y = pl.pallas_call(
        _conv3x3_kernel,
        out_shape=jax.ShapeDtypeStruct((n, ht, th * w_pad, cout), jnp.bfloat16),
        grid=(n, ht),
        in_specs=[
            pl.BlockSpec(memory_space=pl.ANY),                       # windowed by DMA
            pl.BlockSpec((9, cin, cout), lambda ni, ti: (0, 0, 0)),
            pl.BlockSpec((1, cout), lambda ni, ti: (0, 0)),
        ],
        out_specs=pl.BlockSpec((1, 1, th * w_pad, cout),
                               lambda ni, ti: (ni, ti, 0, 0)),
        scratch_shapes=[pltpu.VMEM((th + 2, w_pad + 2, cin), jnp.bfloat16),
                        pltpu.SemaphoreType.DMA((1,))],
        compiler_params=pltpu.CompilerParams(
            dimension_semantics=("parallel", "parallel"),
            vmem_limit_bytes=vmem_limit),
    )(xp, w9, b2)
    return y.reshape(n, h_pad, w_pad, cout)[:, :h, :wd, :]


def conv3x3_stride2(x, w, b):
    """3x3 conv, stride 2, pad 1, computed directly (no dense intermediate)."""
    n, h, wd, cin = x.shape
    cout = w.shape[-1]
    ho = (h - 1) // 2 + 1
    wo = (wd - 1) // 2 + 1
    wo_pad = _round_up(wo, 16)                      # slab path always
    vmem_limit, _, _ = _vmem_budgets()

    x = x.astype(jnp.bfloat16)
    xp = jnp.pad(x, ((0, 0), (1, 1), (1, 1), (0, 0)))

    def _plane(rs, cs):
        p = xp[:, rs::2, cs::2]
        return jnp.pad(p, ((0, 0), (0, ho + 1 - p.shape[1]),
                           (0, wo_pad + 1 - p.shape[2]), (0, 0)))

    planes = [_plane(0, 0), _plane(0, 1), _plane(1, 0), _plane(1, 1)]
    w9 = w.reshape(9, cin, cout).astype(jnp.bfloat16)
    b2 = b.reshape(1, cout).astype(jnp.float32)

    plane_spec = pl.BlockSpec((1, ho + 1, wo_pad + 1, cin), lambda i: (i, 0, 0, 0))
    y = pl.pallas_call(
        _conv3x3_s2_kernel,
        out_shape=jax.ShapeDtypeStruct((n, ho * wo_pad, cout), jnp.bfloat16),
        grid=(n,),
        in_specs=[plane_spec] * 4 + [
            pl.BlockSpec((9, cin, cout), lambda i: (0, 0, 0)),
            pl.BlockSpec((1, cout), lambda i: (0, 0))],
        out_specs=pl.BlockSpec((1, ho * wo_pad, cout), lambda i: (i, 0, 0)),
        compiler_params=pltpu.CompilerParams(
            dimension_semantics=("parallel",),
            vmem_limit_bytes=vmem_limit),
    )(*planes, w9, b2)
    return y.reshape(n, ho, wo_pad, cout)[:, :, :wo, :]


def upsample_nearest(x, out_h, out_w):
    """F.interpolate(mode='nearest'): src = floor(dst * in / out)."""
    n, h, w, c = x.shape
    if out_h % h == 0 and out_w % w == 0:
        fh, fw = out_h // h, out_w // w
        y = jnp.broadcast_to(x[:, :, None, :, None, :], (n, h, fh, w, fw, c))
        return y.reshape(n, out_h, out_w, c)
    hi = (jnp.arange(out_h) * h) // out_h
    wi = (jnp.arange(out_w) * w) // out_w
    return x[:, hi][:, :, wi]


# ------------------------------- parameters -------------------------------

def init_conv_params(key, kh, kw, cin, cout):
    # Deterministic stand-in for PyTorch's default Conv2d init (uniform +-1/sqrt(fan_in)).
    kw_key, kb_key = jax.random.split(key)
    bound = float(1.0 / np.sqrt(kh * kw * cin))
    w = jax.random.uniform(kw_key, (kh, kw, cin, cout), jnp.float32, -bound, bound)
    b = jax.random.uniform(kb_key, (cout,), jnp.float32, -bound, bound)
    return w, b


def make_fpn_params(key, in_channel_list, out_channels):
    params = {'inner': [], 'layer': []}
    for cin in in_channel_list:
        key, k1, k2 = jax.random.split(key, 3)
        params['inner'].append(init_conv_params(k1, 1, 1, cin, out_channels))
        params['layer'].append(init_conv_params(k2, 3, 3, out_channels, out_channels))
    key, k6, k7 = jax.random.split(key, 3)
    # top_blocks = LastLevelP6_P7(in_channels=out_channels, out_channels) -> use_p5=True
    params['p6'] = init_conv_params(k6, 3, 3, out_channels, out_channels)
    params['p7'] = init_conv_params(k7, 3, 3, out_channels, out_channels)
    return params


# ------------------------------- FPN forward -------------------------------

def fpn_forward(xs_nchw, params):
    """xs_nchw: list of NCHW feature maps, highest resolution first (PyTorch order).
    Returns (P3, P4, P5, P6, P7) in NCHW f32, matching FPN.forward."""
    xs = [jnp.transpose(x, (0, 2, 3, 1)).astype(jnp.bfloat16) for x in xs_nchw]
    inner_w = [w.reshape(w.shape[2], w.shape[3]) for (w, _) in params['inner']]
    inner_b = [b for (_, b) in params['inner']]

    last_inner = conv1x1(xs[-1], inner_w[-1], inner_b[-1])
    lw, lb = params['layer'][-1]
    results = [conv3x3_same(last_inner, lw, lb)]

    for i in range(len(xs) - 2, -1, -1):
        feat = xs[i]
        # TODO(synk): fuse this exact-2x expansion into the fused lateral conv kernel
        # so the full-resolution top-down tensor never hits HBM.
        top_down = upsample_nearest(last_inner, feat.shape[1], feat.shape[2])
        last_inner = conv1x1(feat, inner_w[i], inner_b[i], residual=top_down)
        lw, lb = params['layer'][i]
        results.insert(0, conv3x3_same(last_inner, lw, lb))

    # LastLevelP6_P7 with use_p5=True: p6 = conv_s2(P5), p7 = conv_s2(p6) (no ReLU,
    # matching the reference PyTorch module above).
    p6 = conv3x3_stride2(results[-1], *params['p6'])
    p7 = conv3x3_stride2(p6, *params['p7'])
    results.extend([p6, p7])
    return tuple(jnp.transpose(r, (0, 3, 1, 2)).astype(jnp.float32) for r in results)


# ------------------------------- pure-JAX reference -------------------------------

def _ref_conv(x, w, b, stride, pad):
    y = jax.lax.conv_general_dilated(
        x, w, (stride, stride), ((pad, pad), (pad, pad)),
        dimension_numbers=('NHWC', 'HWIO', 'NHWC'))
    return y + b


def ref_fpn_forward(xs_nchw, params):
    xs = [jnp.transpose(x, (0, 2, 3, 1)) for x in xs_nchw]
    last_inner = _ref_conv(xs[-1], *params['inner'][-1], 1, 0)
    results = [_ref_conv(last_inner, *params['layer'][-1], 1, 1)]
    for i in range(len(xs) - 2, -1, -1):
        feat = xs[i]
        lateral = _ref_conv(feat, *params['inner'][i], 1, 0)
        top_down = upsample_nearest(last_inner, feat.shape[1], feat.shape[2])
        last_inner = lateral + top_down
        results.insert(0, _ref_conv(last_inner, *params['layer'][i], 1, 1))
    p6 = _ref_conv(results[-1], *params['p6'], 2, 1)
    p7 = _ref_conv(p6, *params['p7'], 2, 1)
    results.extend([p6, p7])
    return tuple(jnp.transpose(r, (0, 3, 1, 2)) for r in results)


# ------------------------------- main -------------------------------

if __name__ == "__main__":
    key = jax.random.PRNGKey(0)
    in_channel_list = [4, 8, 16]     # C3, C4, C5 channels
    out_channels = 8
    N = 2
    spatials = [16, 8, 4]            # highest resolution first

    key, *xkeys = jax.random.split(key, len(in_channel_list) + 1)
    xs = [jax.random.normal(k, (N, c, s, s), jnp.float32)
          for k, c, s in zip(xkeys, in_channel_list, spatials)]

    key, pkey = jax.random.split(key)
    params = make_fpn_params(pkey, in_channel_list, out_channels)

    outs = fpn_forward(xs, params)
    for o in outs:
        jax.block_until_ready(o)

    refs = ref_fpn_forward(xs, params)
    for o, r in zip(outs, refs):
        np.testing.assert_allclose(np.asarray(o), np.asarray(r), rtol=5e-2, atol=5e-2)

    print("KERNEL_OK")
</pallas_src>

<mosaic_0001>
module attributes {stable_mosaic.version = 11 : i64} {
  func.func @_conv1x1_kernel(%arg0: i32, %arg1: memref<32x16xbf16, #tpu.memory_space<vmem>>, %arg2: memref<16x8xbf16, #tpu.memory_space<vmem>>, %arg3: memref<1x8xf32, #tpu.memory_space<vmem>>, %arg4: memref<32x8xbf16, #tpu.memory_space<vmem>>) attributes {dimension_semantics = [#tpu.dimension_semantics<parallel>], iteration_bounds = array<i64: 1>, scalar_prefetch = 0 : i64, scratch_operands = 0 : i64, tpu.core_type = #tpu.core_type<tc>, window_params = [{transform_indices = @transform_0, window_bounds = array<i64: 32, 16>}, {pipeline_mode = #tpu.pipeline_mode<synchronous>, transform_indices = @transform_1, window_bounds = array<i64: 16, 8>}, {pipeline_mode = #tpu.pipeline_mode<synchronous>, transform_indices = @transform_2, window_bounds = array<i64: 1, 8>}, {transform_indices = @transform_3, window_bounds = array<i64: 32, 8>}]} {
    %c0 = arith.constant 0 : index
    %c0_0 = arith.constant 0 : index
    %0 = vector.load %arg1[%c0, %c0_0] : memref<32x16xbf16, #tpu.memory_space<vmem>>, vector<32x16xbf16>
    %c0_1 = arith.constant 0 : index
    %c0_2 = arith.constant 0 : index
    %1 = vector.load %arg2[%c0_1, %c0_2] : memref<16x8xbf16, #tpu.memory_space<vmem>>, vector<16x8xbf16>
    %cst = arith.constant dense<0.000000e+00> : vector<32x8xf32>
    %2 = tpu.matmul %0, %1, %cst {dimension_numbers = #tpu.dot_dimension_numbers<[1], [0], [0], [1], [0, 0, 1, 1], [], []>} : vector<32x16xbf16>, vector<16x8xbf16>, vector<32x8xf32> -> vector<32x8xf32>
    %c0_3 = arith.constant 0 : index
    %c0_4 = arith.constant 0 : index
    %3 = vector.load %arg3[%c0_3, %c0_4] : memref<1x8xf32, #tpu.memory_space<vmem>>, vector<1x8xf32>
    %4 = vector.broadcast %3 : vector<1x8xf32> to vector<32x8xf32>
    %5 = arith.addf %2, %4 : vector<32x8xf32>
    %6 = arith.truncf %5 : vector<32x8xf32> to vector<32x8xbf16>
    %c0_5 = arith.constant 0 : index
    %c0_6 = arith.constant 0 : index
    %7 = vector.load %arg4[%c0_5, %c0_6] : memref<32x8xbf16, #tpu.memory_space<vmem>>, vector<32x8xbf16>
    tpu.vector_store %arg4[%c0_5, %c0_6], %6 {strides = array<i32>} : memref<32x8xbf16, #tpu.memory_space<vmem>>, vector<32x8xbf16>,
    return
  }
  func.func @transform_0(%arg0: i32) -> (i32, i32) {
    %c0_i32 = arith.constant 0 : i32
    %c0_i32_0 = arith.constant 0 : i32
    return %arg0, %c0_i32 : i32, i32
  }
  func.func @transform_1(%arg0: i32) -> (i32, i32) {
    %c0_i32 = arith.constant 0 : i32
    %c0_i32_0 = arith.constant 0 : i32
    %c0_i32_1 = arith.constant 0 : i32
    return %c0_i32, %c0_i32_0 : i32, i32
  }
  func.func @transform_2(%arg0: i32) -> (i32, i32) {
    %c0_i32 = arith.constant 0 : i32
    %c0_i32_0 = arith.constant 0 : i32
    %c0_i32_1 = arith.constant 0 : i32
    return %c0_i32, %c0_i32_0 : i32, i32
  }
  func.func @transform_3(%arg0: i32) -> (i32, i32) {
    %c0_i32 = arith.constant 0 : i32
    %c0_i32_0 = arith.constant 0 : i32
    return %arg0, %c0_i32 : i32, i32
  }
}

</mosaic_0001>

<bundles_post_ra>
// kernel: tpu_custom_call.1
= control target key start
LH: loop header
LB: loop body
LE: loop exit
PB: predicated region body
PF: predicated region fallthrough
CT: control target
= control target key end

     0   :  { %vm41_vm0 = vcmask 130048   ;;  %vm71_vm1 = vcmask 60416   ;;  %s143_s1 = inlined_call_operand.vmem [shape: bf16[16,8], index: 1, kind: input, shape index: {}]   ;;  %s144_s0 = inlined_call_operand.vmem [shape: bf16[32,16], index: 0, kind: input, shape index: {}]   ;;  %s145_s2 = inlined_call_operand.vmem [shape: f32[1,8], index: 2, kind: input, shape index: {}]   ;;  %s146_s3 = inlined_call_operand.vmem [shape: bf16[32,8], index: 3, kind: output, shape index: {}]  }
   0x1   :  { %v96_v0 = vld [vmem:[%s143_s1] sm:$0xff]  ;;  %v95_v2 = vld [vmem:[%s144_s0 + $0x8] sm:$0xff] }
   0x2   :  { %v94_v1 = vld [vmem:[%s144_s0] sm:$0xff]  ;;  %55 = vmatpush.bf16.msra.mxu0 %v96_v0  ;;  %97 = vmatpush.bf16.msra.mxu1 %v96_v0 }
   0x3   :  { %v98_v3 = vld [vmem:[%s145_s2] ss:$0 sm:$0xff] }
   0x5   :  { %92 = vmatmul.msk.bf16.vlgmr.msra.gmra.mxu0 %vm41_vm0, %v94_v1  ;;  %93 = vmatmul.msk.bf16.vlgmr.msra.gmra.mxu1 %vm41_vm0, %v95_v2 }
  0x82   :  { %v57_v4 = vpop.f32.mrf.mxu0  ;;  %v62_v5 = vpop.f32.mrf.mxu1 }
  0x83   :  { %v58_v6 = vadd.f32 %v98_v3, %v57_v4  ;;  %v63_v7 = vadd.f32 %v98_v3, %v62_v5 }
  0x85   :  { %v67_v8 = vpack.c.bf16 %v58_v6, %v58_v6  ;;  %v69_v9 = vpack.c.bf16 %v63_v7, %v63_v7 }
  0x87   :  { %72 = vst.msk [vmem:[%s146_s3] sm:$0xf] %vm71_vm1, %v67_v8 }
  0x88   :  { %74 = vst.msk [vmem:[%s146_s3 + $0x8] sm:$0xf] %vm71_vm1, %v69_v9 }
  0x8a   :  { %v59_v10 = vpop.f32.mrf.mxu0  ;;  %v64_v11 = vpop.f32.mrf.mxu1 }
  0x8b   :  { %v60_v12 = vadd.f32 %v98_v3, %v59_v10  ;;  %v65_v13 = vadd.f32 %v98_v3, %v64_v11 }
  0x8d   :  { %v68_v14 = vpack.c.bf16 %v60_v12, %v60_v12  ;;  %v70_v15 = vpack.c.bf16 %v65_v13, %v65_v13 }
  0x8f   :  { %73 = vst.msk [vmem:[%s146_s3 + $0x4] sm:$0xf] %vm71_vm1, %v68_v14 }
  0x90   :  { %75 = vst.msk [vmem:[%s146_s3 + $0xc] sm:$0xf] %vm71_vm1, %v70_v15 }

</bundles_post_ra>
